<compile_context>
chip_gen: v6e
topology: v6e:2x2x1
jax: 0.10.0
libtpu: 0.0.40
codegen_flags: <defaults>
</compile_context>

<pallas_src>
import functools
import math

import jax
import jax.numpy as jnp
from jax.experimental import pallas as pl
from jax.experimental.pallas import tpu as pltpu


# ----------------------------------------------------------------------------
# Host-side helpers (trace time)
# ----------------------------------------------------------------------------

def _round_up(x, m):
    return (x + m - 1) // m * m


def _divisors(n):
    ds, i = set(), 1
    while i * i <= n:
        if n % i == 0:
            ds.add(i)
            ds.add(n // i)
        i += 1
    return sorted(ds)


def _padded2d_bytes(rows, cols, itemsize):
    # VMEM tiles are (sublane, lane) = (8, 128) 32-bit words; sub-32-bit dtypes
    # pack along sublanes (bf16 -> 16, int8 -> 32).
    sublane = max(8, 32 // itemsize)
    return _round_up(max(rows, 1), sublane) * _round_up(max(cols, 1), 128) * itemsize


def _padded_block_bytes(bt, c, hw, itemsize):
    return bt * _padded2d_bytes(c, hw, itemsize)


def _tpu_info():
    """(physical VMEM bytes, TensorCores per device) with safe fallbacks."""
    vmem_cap = 128 << 20
    try:
        vmem_cap = int(pltpu.get_tpu_info().vmem_capacity_bytes)
    except Exception:
        pass
    kind = ""
    try:
        kind = jax.devices()[0].device_kind.lower()
    except Exception:
        pass
    dual_tc = any(t in kind for t in ("v4", "v5p", "v7"))
    return vmem_cap, (2 if dual_tc else 1)


def _choose_bt(batch, per_batch_bytes, target_block, block_cap, min_grid, n_tc):
    """Batch tile for the single-pass kernel (None if even bt=1 does not fit)."""
    feasible = [d for d in _divisors(batch) if d * per_batch_bytes <= block_cap]
    if not feasible:
        return None

    def score(bt):
        grid = batch // bt
        blk = bt * per_batch_bytes
        return (grid >= min_grid,           # enough steps to pipeline / feed all TCs
                grid % n_tc == 0,           # balanced across TensorCores
                -abs(blk - target_block))   # blocks near the DMA sweet spot
    return max(feasible, key=score)


def _choose_thw(hw, c, itemsize, target_block, block_cap):
    """Spatial tile for the two-pass (reduce-then-scale) kernels."""
    def score(d):
        blk = _padded_block_bytes(1, c, d, itemsize)
        return (blk <= block_cap,           # fits the per-block VMEM budget
                hw // d >= 2,               # >=2 steps so the DMA pipelines
                d % 128 == 0,               # lane-dense rows / stores
                -abs(blk - target_block))
    return max(_divisors(hw), key=score)


# ----------------------------------------------------------------------------
# Kernels
# ----------------------------------------------------------------------------

def _mlp_gate(pooled, w1_ref, b1_ref, w2_ref, b2_ref, *, use_mxu, bt):
    """Shared MLP on the stacked (2*bt, C) [avg; max] matrix -> (bt, C) gate."""
    b1 = b1_ref[...]
    b2 = b2_ref[...]
    if use_mxu:
        # Weights arrive pre-transposed: w1 (C, hidden), w2 (hidden, C), so
        # both layers are plain (M, K) x (K, N) MXU dots (no in-kernel relayout).
        h = jnp.dot(pooled, w1_ref[...], preferred_element_type=jnp.float32) + b1
        h = jnp.maximum(h, 0.0)
        g = jnp.dot(h, w2_ref[...], preferred_element_type=jnp.float32) + b2
    else:
        # Tiny C / hidden: VPU broadcast-mul + lane-axis reduce; the MXU would
        # be almost entirely padding.  Weights stay in PyTorch layout:
        # w1 (hidden, C), w2 (C, hidden).
        h = jnp.sum(pooled[:, None, :] * w1_ref[...][None, :, :], axis=-1) + b1
        h = jnp.maximum(h, 0.0)
        g = jnp.sum(h[:, None, :] * w2_ref[...][None, :, :], axis=-1) + b2
    g = jax.nn.sigmoid(g)                       # MLP out_activation
    # avg-branch + max-branch, then the module's outer sigmoid (double sigmoid
    # intentionally matches the PyTorch forward).
    return jax.nn.sigmoid(g[:bt] + g[bt:])      # (bt, C) float32


def _single_pass_kernel(x_ref, w1_ref, b1_ref, w2_ref, b2_ref, o_ref, *, use_mxu):
    bt = x_ref.shape[0]
    inv_hw = 1.0 / x_ref.shape[-1]
    # Pool without materializing an f32 copy of the block: mean accumulates in
    # f32, max is exact in the input dtype.
    avg = jnp.sum(x_ref[...], axis=-1, dtype=jnp.float32) * inv_hw   # (bt, C)
    mx = jnp.max(x_ref[...], axis=-1).astype(jnp.float32)            # (bt, C)
    pooled = jnp.concatenate([avg, mx], axis=0)                      # (2bt, C)
    gate = _mlp_gate(pooled, w1_ref, b1_ref, w2_ref, b2_ref,
                     use_mxu=use_mxu, bt=bt)
    # Scale in the input dtype so the store path stays packed (bf16 I/O).
    o_ref[...] = x_ref[...] * gate[:, :, None].astype(o_ref.dtype)


def _reduce_gate_kernel(x_ref, w1_ref, b1_ref, w2_ref, b2_ref, gate_ref,
                        sum_sc, max_sc, *, use_mxu, inv_hw):
    """Two-pass path, pass 1: accumulate sum/max over HW tiles, emit the gate
    on the last HW step (HW axis is the 'arbitrary' reduction axis)."""
    hw_i = pl.program_id(1)

    @pl.when(hw_i == 0)
    def _():
        sum_sc[...] = jnp.zeros_like(sum_sc)
        max_sc[...] = jnp.full_like(max_sc, -jnp.inf)

    sum_sc[...] += jnp.sum(x_ref[...], axis=-1, dtype=jnp.float32)
    max_sc[...] = jnp.maximum(
        max_sc[...], jnp.max(x_ref[...], axis=-1).astype(jnp.float32))

    @pl.when(hw_i == pl.num_programs(1) - 1)
    def _():
        bt = sum_sc.shape[0]
        avg = sum_sc[...] * inv_hw
        pooled = jnp.concatenate([avg, max_sc[...]], axis=0)
        gate_ref[...] = _mlp_gate(pooled, w1_ref, b1_ref, w2_ref, b2_ref,
                                  use_mxu=use_mxu, bt=bt)


def _scale_kernel(gate_ref, x_ref, o_ref):
    """Two-pass path, pass 2: lane-dense gate * x."""
    o_ref[...] = x_ref[...] * gate_ref[...][:, :, None].astype(o_ref.dtype)


# ----------------------------------------------------------------------------
# Wrapper
# ----------------------------------------------------------------------------

def channel_attention_2d(x, w1, b1, w2, b2):
    """x: (B, C, H, W). Weights in PyTorch Linear layout:
       w1: (hidden, C), b1: (hidden,), w2: (C, hidden), b2: (C,)."""
    B, C, H, W = x.shape
    HW = H * W
    hidden = w1.shape[0]
    itemsize = jnp.dtype(x.dtype).itemsize
    x3 = x.reshape(B, C, HW)
    # NOTE: for best store/DMA efficiency HW should be a multiple of 128 (it is
    # for 16x16 here); production shapes like 7x7/14x14 would benefit from
    # padding HW to a 128 multiple in the wrapper.

    # --- generation-aware budgets --------------------------------------------
    vmem_cap, n_tc = _tpu_info()
    safe_vmem = max(24 << 20, min(vmem_cap - (16 << 20), int(vmem_cap * 0.75)))
    target_block = (4 << 20) if vmem_cap <= (64 << 20) else (2 << 20)
    min_grid = max(2, 2 * n_tc)

    weight_buf_bytes = 2 * (_padded2d_bytes(hidden, C, 4)
                            + _padded2d_bytes(C, hidden, 4)
                            + _padded2d_bytes(1, hidden, 4)
                            + _padded2d_bytes(1, C, 4))
    # Per-block cap: double-buffered in + out blocks, weights and slack must
    # all fit under the scoped VMEM limit.
    block_cap = max(1 << 20, (safe_vmem - weight_buf_bytes - (2 << 20)) // 4)

    # --- MXU only pays off once the contraction dims approach a tile ---------
    use_mxu = (C >= 128) and (hidden >= 8)
    if use_mxu:
        w1p = w1.T.astype(jnp.float32)          # (C, hidden)
        w2p = w2.T.astype(jnp.float32)          # (hidden, C)
    else:
        w1p = w1.astype(jnp.float32)            # (hidden, C)
        w2p = w2.astype(jnp.float32)            # (C, hidden)
    b1r = b1.reshape(1, hidden).astype(jnp.float32)
    b2r = b2.reshape(1, C).astype(jnp.float32)

    # --- choose between single-pass and two-pass structures -------------------
    per_batch = _padded_block_bytes(1, C, HW, itemsize)
    bt = _choose_bt(B, per_batch, target_block, block_cap, min_grid, n_tc)
    two_pass = (bt is None) or (B // bt == 1 and HW % 128 == 0 and HW >= 256)

    if not two_pass:
        grid_b = B // bt
        blk = _padded_block_bytes(bt, C, HW, itemsize)
        vmem_limit = int(min(safe_vmem,
                             max(4 * blk + weight_buf_bytes + (2 << 20),
                                 24 << 20)))
        kernel = functools.partial(_single_pass_kernel, use_mxu=use_mxu)
        # TODO(synk): if profiling shows exposed DMA at small grids, add
        # pipeline_mode=pl.Buffered(3) to the x/out BlockSpecs (re-check VMEM).
        out3 = pl.pallas_call(
            kernel,
            out_shape=jax.ShapeDtypeStruct((B, C, HW), x.dtype),
            grid_spec=pltpu.PrefetchScalarGridSpec(
                num_scalar_prefetch=0,
                grid=(grid_b,),
                in_specs=[
                    pl.BlockSpec((bt, C, HW), lambda b: (b, 0, 0)),
                    pl.BlockSpec(w1p.shape, lambda b: (0, 0)),
                    pl.BlockSpec((1, hidden), lambda b: (0, 0)),
                    pl.BlockSpec(w2p.shape, lambda b: (0, 0)),
                    pl.BlockSpec((1, C), lambda b: (0, 0)),
                ],
                out_specs=pl.BlockSpec((bt, C, HW), lambda b: (b, 0, 0)),
            ),
            compiler_params=pltpu.CompilerParams(
                dimension_semantics=("parallel",),
                vmem_limit_bytes=vmem_limit,
            ),
        )(x3, w1p, b1r, w2p, b2r)
        return out3.reshape(B, C, H, W)

    # --- two-pass: reduce-then-scale (B == 1 or per-element block too big) ----
    thw = _choose_thw(HW, C, itemsize, target_block, block_cap)
    n_hw = HW // thw
    blk = _padded_block_bytes(1, C, thw, itemsize)
    gate_bytes = _padded2d_bytes(1, C, 4)

    vmem_limit_1 = int(min(safe_vmem,
                           max(2 * blk + weight_buf_bytes + 4 * gate_bytes
                               + (2 << 20), 24 << 20)))
    reduce_kernel = functools.partial(_reduce_gate_kernel, use_mxu=use_mxu,
                                      inv_hw=1.0 / HW)
    gate = pl.pallas_call(
        reduce_kernel,
        out_shape=jax.ShapeDtypeStruct((B, C), jnp.float32),
        grid_spec=pltpu.PrefetchScalarGridSpec(
            num_scalar_prefetch=0,
            grid=(B, n_hw),
            in_specs=[
                pl.BlockSpec((1, C, thw), lambda b, h: (b, 0, h)),
                pl.BlockSpec(w1p.shape, lambda b, h: (0, 0)),
                pl.BlockSpec((1, hidden), lambda b, h: (0, 0)),
                pl.BlockSpec(w2p.shape, lambda b, h: (0, 0)),
                pl.BlockSpec((1, C), lambda b, h: (0, 0)),
            ],
            out_specs=pl.BlockSpec((1, C), lambda b, h: (b, 0)),
            scratch_shapes=[pltpu.VMEM((1, C), jnp.float32),
                            pltpu.VMEM((1, C), jnp.float32)],
        ),
        compiler_params=pltpu.CompilerParams(
            dimension_semantics=("parallel", "arbitrary"),
            vmem_limit_bytes=vmem_limit_1,
        ),
    )(x3, w1p, b1r, w2p, b2r)

    vmem_limit_2 = int(min(safe_vmem,
                           max(4 * blk + 2 * gate_bytes + (2 << 20), 24 << 20)))
    out3 = pl.pallas_call(
        _scale_kernel,
        out_shape=jax.ShapeDtypeStruct((B, C, HW), x.dtype),
        grid_spec=pltpu.PrefetchScalarGridSpec(
            num_scalar_prefetch=0,
            grid=(B, n_hw),
            in_specs=[
                pl.BlockSpec((1, C), lambda b, h: (b, 0)),
                pl.BlockSpec((1, C, thw), lambda b, h: (b, 0, h)),
            ],
            out_specs=pl.BlockSpec((1, C, thw), lambda b, h: (b, 0, h)),
        ),
        compiler_params=pltpu.CompilerParams(
            dimension_semantics=("parallel", "parallel"),
            vmem_limit_bytes=vmem_limit_2,
        ),
    )(gate, x3)
    return out3.reshape(B, C, H, W)


# ----------------------------------------------------------------------------
# Reference + demo
# ----------------------------------------------------------------------------

def reference(x, w1, b1, w2, b2):
    """Pure-JAX reference reproducing the PyTorch forward."""
    avg = x.mean(axis=(2, 3))                             # (B, C)
    mx = x.max(axis=(2, 3))                               # (B, C)

    def mlp(v):
        h = jnp.maximum(v @ w1.T + b1, 0.0)
        return jax.nn.sigmoid(h @ w2.T + b2)

    gate = jax.nn.sigmoid(mlp(avg) + mlp(mx))             # (B, C)
    return gate[:, :, None, None] * x


if __name__ == "__main__":
    def run_case(B, C, H, W, r, seed):
        hidden = max(1, C // r)
        key = jax.random.PRNGKey(seed)
        kx, k1, k2, k3, k4 = jax.random.split(key, 5)
        x = jax.random.normal(kx, (B, C, H, W), jnp.float32)

        # Deterministic PyTorch-Linear-style init: U(-1/sqrt(fan_in), 1/sqrt(fan_in)).
        bound1 = 1.0 / math.sqrt(C)
        w1 = jax.random.uniform(k1, (hidden, C), jnp.float32, -bound1, bound1)
        b1 = jax.random.uniform(k2, (hidden,), jnp.float32, -bound1, bound1)
        bound2 = 1.0 / math.sqrt(hidden)
        w2 = jax.random.uniform(k3, (C, hidden), jnp.float32, -bound2, bound2)
        b2 = jax.random.uniform(k4, (C,), jnp.float32, -bound2, bound2)

        out = channel_attention_2d(x, w1, b1, w2, b2)
        jax.block_until_ready(out)
        ref = reference(x, w1, b1, w2, b2)
        assert out.shape == (B, C, H, W)
        assert jnp.allclose(out, ref, atol=1e-5, rtol=1e-5), (
            f"mismatch: B={B} C={C} H={H} W={W}")

    # Single-pass path (batch tiled over a parallel 1-D grid).
    run_case(B=2, C=4, H=16, W=16, r=2, seed=0)
    # Two-pass reduce-then-scale path (B == 1 -> HW-split 'arbitrary' axis).
    run_case(B=1, C=4, H=16, W=16, r=2, seed=0)

    print("KERNEL_OK")
</pallas_src>

<mosaic_0001>
module attributes {stable_mosaic.version = 11 : i64} {
  func.func @_single_pass_kernel(%arg0: i32, %arg1: memref<1x4x256xf32, #tpu.memory_space<vmem>>, %arg2: memref<2x4xf32, #tpu.memory_space<vmem>>, %arg3: memref<1x2xf32, #tpu.memory_space<vmem>>, %arg4: memref<4x2xf32, #tpu.memory_space<vmem>>, %arg5: memref<1x4xf32, #tpu.memory_space<vmem>>, %arg6: memref<1x4x256xf32, #tpu.memory_space<vmem>>) attributes {dimension_semantics = [#tpu.dimension_semantics<parallel>], iteration_bounds = array<i64: 2>, scalar_prefetch = 0 : i64, scratch_operands = 0 : i64, tpu.core_type = #tpu.core_type<tc>, window_params = [{transform_indices = @transform_0, window_bounds = array<i64: 1, 4, 256>}, {pipeline_mode = #tpu.pipeline_mode<synchronous>, transform_indices = @transform_1, window_bounds = array<i64: 2, 4>}, {pipeline_mode = #tpu.pipeline_mode<synchronous>, transform_indices = @transform_2, window_bounds = array<i64: 1, 2>}, {pipeline_mode = #tpu.pipeline_mode<synchronous>, transform_indices = @transform_3, window_bounds = array<i64: 4, 2>}, {pipeline_mode = #tpu.pipeline_mode<synchronous>, transform_indices = @transform_4, window_bounds = array<i64: 1, 4>}, {transform_indices = @transform_5, window_bounds = array<i64: 1, 4, 256>}]} {
    %c0 = arith.constant 0 : index
    %c0_0 = arith.constant 0 : index
    %c0_1 = arith.constant 0 : index
    %0 = vector.load %arg1[%c0, %c0_0, %c0_1] : memref<1x4x256xf32, #tpu.memory_space<vmem>>, vector<1x4x256xf32>
    %cst = arith.constant dense<0.000000e+00> : vector<1x4xf32>
    %1 = vector.multi_reduction <add>, %0, %cst [2] : vector<1x4x256xf32> to vector<1x4xf32>
    %cst_2 = arith.constant 3.906250e-03 : f32
    %2 = vector.broadcast %cst_2 : f32 to vector<1x4xf32>
    %3 = arith.mulf %1, %2 : vector<1x4xf32>
    %c0_3 = arith.constant 0 : index
    %c0_4 = arith.constant 0 : index
    %c0_5 = arith.constant 0 : index
    %4 = vector.load %arg1[%c0_3, %c0_4, %c0_5] : memref<1x4x256xf32, #tpu.memory_space<vmem>>, vector<1x4x256xf32>
    %cst_6 = arith.constant dense<0xFF800000> : vector<1x4xf32>
    %5 = vector.multi_reduction <maximumf>, %4, %cst_6 [2] : vector<1x4x256xf32> to vector<1x4xf32>
    %6 = tpu.concatenate %3, %5 in 0 : vector<1x4xf32>, vector<1x4xf32> -> vector<2x4xf32>
    %c0_7 = arith.constant 0 : index
    %c0_8 = arith.constant 0 : index
    %7 = vector.load %arg3[%c0_7, %c0_8] : memref<1x2xf32, #tpu.memory_space<vmem>>, vector<1x2xf32>
    %c0_9 = arith.constant 0 : index
    %c0_10 = arith.constant 0 : index
    %8 = vector.load %arg5[%c0_9, %c0_10] : memref<1x4xf32, #tpu.memory_space<vmem>>, vector<1x4xf32>
    %9 = vector.shape_cast %6 : vector<2x4xf32> to vector<2x1x4xf32>
    %c0_11 = arith.constant 0 : index
    %c0_12 = arith.constant 0 : index
    %10 = vector.load %arg2[%c0_11, %c0_12] : memref<2x4xf32, #tpu.memory_space<vmem>>, vector<2x4xf32>
    %11 = vector.shape_cast %10 : vector<2x4xf32> to vector<1x2x4xf32>
    %12 = vector.broadcast %9 : vector<2x1x4xf32> to vector<2x2x4xf32>
    %13 = vector.broadcast %11 : vector<1x2x4xf32> to vector<2x2x4xf32>
    %14 = arith.mulf %12, %13 : vector<2x2x4xf32>
    %cst_13 = arith.constant dense<0.000000e+00> : vector<2x2xf32>
    %15 = vector.multi_reduction <add>, %14, %cst_13 [2] : vector<2x2x4xf32> to vector<2x2xf32>
    %16 = vector.broadcast %7 : vector<1x2xf32> to vector<2x2xf32>
    %17 = arith.addf %15, %16 : vector<2x2xf32>
    %cst_14 = arith.constant 0.000000e+00 : f32
    %18 = vector.broadcast %cst_14 : f32 to vector<2x2xf32>
    %19 = arith.maximumf %17, %18 : vector<2x2xf32>
    %20 = vector.shape_cast %19 : vector<2x2xf32> to vector<2x1x2xf32>
    %c0_15 = arith.constant 0 : index
    %c0_16 = arith.constant 0 : index
    %21 = vector.load %arg4[%c0_15, %c0_16] : memref<4x2xf32, #tpu.memory_space<vmem>>, vector<4x2xf32>
    %22 = vector.shape_cast %21 : vector<4x2xf32> to vector<1x4x2xf32>
    %23 = vector.broadcast %20 : vector<2x1x2xf32> to vector<2x4x2xf32>
    %24 = vector.broadcast %22 : vector<1x4x2xf32> to vector<2x4x2xf32>
    %25 = arith.mulf %23, %24 : vector<2x4x2xf32>
    %cst_17 = arith.constant dense<0.000000e+00> : vector<2x4xf32>
    %26 = vector.multi_reduction <add>, %25, %cst_17 [2] : vector<2x4x2xf32> to vector<2x4xf32>
    %27 = vector.broadcast %8 : vector<1x4xf32> to vector<2x4xf32>
    %28 = arith.addf %26, %27 : vector<2x4xf32>
    %29 = arith.negf %28 : vector<2x4xf32>
    %30 = math.exp %29 : vector<2x4xf32>
    %cst_18 = arith.constant 1.000000e+00 : f32
    %31 = vector.broadcast %cst_18 : f32 to vector<2x4xf32>
    %32 = arith.addf %31, %30 : vector<2x4xf32>
    %33 = arith.divf %31, %32 : vector<2x4xf32>
    %34 = vector.extract_strided_slice %33 {offsets = [0, 0], sizes = [1, 4], strides = [1, 1]} : vector<2x4xf32> to vector<1x4xf32>
    %35 = vector.extract_strided_slice %33 {offsets = [1, 0], sizes = [1, 4], strides = [1, 1]} : vector<2x4xf32> to vector<1x4xf32>
    %36 = arith.addf %34, %35 : vector<1x4xf32>
    %37 = arith.negf %36 : vector<1x4xf32>
    %38 = math.exp %37 : vector<1x4xf32>
    %cst_19 = arith.constant 1.000000e+00 : f32
    %39 = vector.broadcast %cst_19 : f32 to vector<1x4xf32>
    %40 = arith.addf %39, %38 : vector<1x4xf32>
    %41 = arith.divf %39, %40 : vector<1x4xf32>
    %c0_20 = arith.constant 0 : index
    %c0_21 = arith.constant 0 : index
    %c0_22 = arith.constant 0 : index
    %42 = vector.load %arg1[%c0_20, %c0_21, %c0_22] : memref<1x4x256xf32, #tpu.memory_space<vmem>>, vector<1x4x256xf32>
    %43 = vector.shape_cast %41 : vector<1x4xf32> to vector<1x4x1xf32>
    %44 = vector.broadcast %43 : vector<1x4x1xf32> to vector<1x4x256xf32>
    %45 = arith.mulf %42, %44 : vector<1x4x256xf32>
    %c0_23 = arith.constant 0 : index
    %c0_24 = arith.constant 0 : index
    %c0_25 = arith.constant 0 : index
    %46 = vector.load %arg6[%c0_23, %c0_24, %c0_25] : memref<1x4x256xf32, #tpu.memory_space<vmem>>, vector<1x4x256xf32>
    tpu.vector_store %arg6[%c0_23, %c0_24, %c0_25], %45 {strides = array<i32>} : memref<1x4x256xf32, #tpu.memory_space<vmem>>, vector<1x4x256xf32>,
    return
  }
  func.func @transform_0(%arg0: i32) -> (i32, i32, i32) {
    %c0_i32 = arith.constant 0 : i32
    %c0_i32_0 = arith.constant 0 : i32
    %c0_i32_1 = arith.constant 0 : i32
    return %arg0, %c0_i32, %c0_i32_0 : i32, i32, i32
  }
  func.func @transform_1(%arg0: i32) -> (i32, i32) {
    %c0_i32 = arith.constant 0 : i32
    %c0_i32_0 = arith.constant 0 : i32
    %c0_i32_1 = arith.constant 0 : i32
    return %c0_i32, %c0_i32_0 : i32, i32
  }
  func.func @transform_2(%arg0: i32) -> (i32, i32) {
    %c0_i32 = arith.constant 0 : i32
    %c0_i32_0 = arith.constant 0 : i32
    %c0_i32_1 = arith.constant 0 : i32
    return %c0_i32, %c0_i32_0 : i32, i32
  }
  func.func @transform_3(%arg0: i32) -> (i32, i32) {
    %c0_i32 = arith.constant 0 : i32
    %c0_i32_0 = arith.constant 0 : i32
    %c0_i32_1 = arith.constant 0 : i32
    return %c0_i32, %c0_i32_0 : i32, i32
  }
  func.func @transform_4(%arg0: i32) -> (i32, i32) {
    %c0_i32 = arith.constant 0 : i32
    %c0_i32_0 = arith.constant 0 : i32
    %c0_i32_1 = arith.constant 0 : i32
    return %c0_i32, %c0_i32_0 : i32, i32
  }
  func.func @transform_5(%arg0: i32) -> (i32, i32, i32) {
    %c0_i32 = arith.constant 0 : i32
    %c0_i32_0 = arith.constant 0 : i32
    %c0_i32_1 = arith.constant 0 : i32
    return %arg0, %c0_i32, %c0_i32_0 : i32, i32, i32
  }
}

</mosaic_0001>

<bundles_post_ra>
// kernel: tpu_custom_call.1
= control target key start
LH: loop header
LB: loop body
LE: loop exit
PB: predicated region body
PF: predicated region fallthrough
CT: control target
= control target key end

     0   :  { %10 = vsyncpa [#allocation3], 0  ;;  %s989_s0 = inlined_call_operand.hbm [shape: f32[2,4,256], index: 0, kind: input, shape index: {}]   ;;  %s990_s1 = inlined_call_operand.vmem [shape: f32[2,4], index: 1, kind: input, shape index: {}]   ;;  %s991_s2 = inlined_call_operand.vmem [shape: f32[1,2], index: 2, kind: input, shape index: {}]   ;;  %s992_s3 = inlined_call_operand.vmem [shape: f32[4,2], index: 3, kind: input, shape index: {}]   ;;  %s993_s4 = inlined_call_operand.vmem [shape: f32[1,4], index: 4, kind: input, shape index: {}]   ;;  %s994_s5 = inlined_call_operand.hbm [shape: f32[2,4,256], index: 5, kind: output, shape index: {}]  }
   0x1   :  { %12 = vsyncpa [#allocation3 + $0x1], 0 }
   0x2   :  { %13 = vsyncpa [#allocation4], 0 }
   0x3   :  { %15 = vsyncpa [#allocation4 + $0x1], 0  ;;  %s798_s18 = smov 0   ;;  %s800_s19 = smov 0  }
   0x4   :  { %s802_s20 = smov 0   ;;  %s804_s21 = smov 0  }
   0x5 LB: > { %s819_s22 = sadd.s32 4294967295, %s761_s21   ;;  %s584_s23 = sadd.s32 4294967294, %s761_s21   ;;  %s761_s21 = sphi %s804_s21, %s1011_s21   ;;  %s757_s20 = sphi %s802_s20, %s1010_s20   ;;  %s753_s19 = sphi %s800_s19, %s1009_s19   ;;  %s749_s18 = sphi %s798_s18, %s1008_s18  }
   0x6   : > { %s823_s24 = sadd.s32 1, %s761_s21   ;;  %s28_s25 = sadd.s32 1, %s757_s20 }
   0x7   : > { %s25_s26 = ssub.s32 %s761_s21, %s823_s24  ;;  %p35_p0 = scmp.ne.s32.totalorder %s757_s20, %s753_s19 }
   0x8   : > { %p26_p1 = scmp.eq.s32.totalorder %s25_s26, 0  ;;  %p36_p2 = scmp.eq.s32.totalorder %s761_s21, 0 }
   0x9   : > { %p41_p3 = scmp.ne.s32.totalorder %s753_s19, %s749_s18  ;;  %p42_p4 = scmp.eq.s32.totalorder %s819_s22, 0 }
   0xa   : > { %s835_s27 = scalar_select %p26_p1, %s757_s20, %s28_s25  }
   0xb   : > { %p837_p5 = por %p36_p2, %p35_p0  ;;  %p841_p6 = por %p42_p4, %p41_p3 }
   0xc   : > { %p149_p7 = scmp.eq.s32.totalorder %s819_s22, 1  ;;  %p155_p8 = scmp.eq.s32.totalorder %s584_s23, 1 }
   0xd   : > { %s998_s29 = scalar_select %p841_p6, 1, 0 }
   0xe   : > { %p617_p10 = scmp.lt.s32.totalorder %s761_s21, 2  ;;  %p848_p11 = por %p149_p7, %p35_p0 }
   0xf   : > { %p852_p12 = por %p155_p8, %p41_p3  ;;  %s187_s7 = sand.u32 1, %s757_s20  }
  0x10   : > { %s999_s30 = scalar_select %p848_p11, 1, 0 }
  0x11   : > { %s1000_s6 = scalar_select %p852_p12, 1, 0 }
  0x12   : > { %s603_s8 = sshll.u32 %s761_s21, 7  ;;  %s587_s9 = sshll.u32 %s187_s7, 3 }
  0x13   : > { %s861_s12 = scalar_lea.hbm %s989_s0, %s603_s8  ;;  %s191_s13 = scalar_lea.vmem [#allocation2], %s587_s9 }
  0x14   : > { %s199_s14 = sshll.u32 %s191_s13, 4  ;;  %p865_p13 = pnand %p617_p10, %p837_p5  ;;  %s869_s14 = int_to_ptr.vmem [resolvable:$true] %s199_s14 }
  0x15   : > { %s188_s16 = scalar_lea.sflag [#allocation3], %s187_s7  ;;  %s669_s17 = scalar_lea.hbm %s861_s12, 128 }
  0x16   : > { %p670_p2 = scmp.ne.s32.totalorder %s861_s12, %s669_s17  ;;  %p671_p3 = pneg %p865_p13 }
  0x17   : > { %s674_s26 = scalar_lea.hbm %s989_s0, 256  ;;  %p675_p5 = scmp.lt.s32.totalorder %s861_s12, %s989_s0 }
  0x18   : > { %p672_p4 = pnand %p671_p3, %p670_p2  ;;  %p676_p8 = scmp.lt.s32.totalorder %s674_s26, %s669_s17 }
  0x1a   : > { %p673_p7 = pneg %p672_p4  ;;  %p677_p10 = por %p676_p8, %p675_p5 }
  0x1c   : > { %p678_p9 = pnand %p677_p10, %p673_p7 }
  0x1e   : > { %681 = shalt.err (!%p678_p9)
}
  0x1f   : > { %s682_s7 = scalar_lea.vmem %s869_s14, 128  ;;  %s763_s9 = smov [#allocation2]  }
  0x20   : > { %p683_p0 = scmp.ne.s32.totalorder %s869_s14, %s682_s7  ;;  %s687_s10 = sshll.u32 %s763_s9, 4  ;;  %s688_s10 = int_to_ptr.vmem [resolvable:$false] %s687_s10 }
  0x21   : > { %s689_s11 = scalar_lea.vmem %s688_s10, 256  ;;  %p690_p4 = scmp.lt.s32.totalorder %s869_s14, %s688_s10 }
  0x22   : > { %p685_p1 = pnand %p683_p0, %p671_p3  ;;  %p691_p12 = scmp.lt.s32.totalorder %s689_s11, %s682_s7 }
  0x24   : > { %p686_p2 = pneg %p685_p1  ;;  %p692_p11 = por %p691_p12, %p690_p4 }
  0x26   : > { %p693_p6 = pnand %p692_p11, %p686_p2 }
  0x28   : > { %696 = shalt.err (!%p693_p6)
}
  0x29   : > { %612 = dma.hbm_to_vmem [thread:$0]  (!%p865_p13), %s861_s12, 128, %s869_s14, %s188_s16  }
  0x2a   : > { %p1002_p9 = scmp.lt.s32.totalorder %s761_s21, 3  ;;  %p1003_p7 = scmp.ge.s32.totalorder %s761_s21, 1 }
  0x2c   : > { %p205_p0 = pnand %p1003_p7, %p1002_p9 }
  0x2d   : > { %s896_s13 = sand.u32 (!%p205_p0), 1, %s753_s19   ;;  %p1004_p6 = scmp.ne.s32.totalorder (!%p205_p0), %s998_s29, 0 }
  0x2e   : > { %208 = sbr.rel (%p205_p0) target bundleno = 847 (0x34f), region = 40  ;;  %s591_s17 = sshll.u32 (!%p205_p0), %s896_s13, 3 }
  0x2f   : > { %s211_s23 = scalar_lea.sflag (!%p205_p0), [#allocation3], %s896_s13  ;;  %s214_s15 = scalar_lea.vmem (!%p205_p0), [#allocation2], %s591_s17 }
  0x33   : > { %740 = dma.done.wait (%p1004_p6), %s211_s23, 128  }
  0x34   : > { %742 = vsyncadd (%p1004_p6), %s211_s23, 4294967168  ;;  %v258_v0 = vlaneseq  ;;  %vm245_vm0 = vcmask 1043456   ;;  %v910_v4 = vld [vmem:[%s214_s15] sm:$0xff]  ;;  %v764_v18 = vmov 1966171168   ;;  %vm271_vm1 = vcmask 1040384  }
  0x35   : > { %v331_v5 = vld [vmem:[%s992_s3] sm:$0xf]  ;;  %v243_v6 = vcombine.high %v910_v4, %v910_v4  ;;  %v246_v7 = vsel %vm245_vm0, %v910_v4, 0.0  ;;  %v252_v10 = vsel %vm245_vm0, %v910_v4, -inf  ;;  %v277_v19 = vunpack.c.l.s4 %v764_v18  ;;  %s604_s7 = sshll.u32 %s819_s22, 7  ;;  %s240_s9 = scalar_lea.vmem [#allocation5], %s591_s17 }
  0x36   : > { %v906_v1 = vshrl.u32 %v258_v0, 7  ;;  %v593_v15 = vld [vmem:[%s991_s2] ss:$0 sm:$0xff]  ;;  %v259_v20 = vand.u32 127, %v258_v0  ;;  %vm311_vm2 = vcmask 25600   ;;  %v765_v42 = vmov 0   ;;  %s512_s15 = scalar_lea.hbm %s994_s5, %s604_s7 }
  0x37   : > { %v247_v9 = vsel %vm245_vm0, %v243_v6, 0.0  ;;  %v253_v11 = vsel %vm245_vm0, %v243_v6, -inf  ;;  %v278_v22 = vunpack.c.0.s8 %v277_v19  ;;  %v298_v33 = vld [vmem:[%s990_s1] sm:$0x3]  ;;  %655 = vset.pattern.permute.xlu0 %v765_v42  ;;  %654 = vset.pattern.permute.xlu1 %v765_v42  ;;  %vm437_vm3 = vcmask 1041409   ;;  %s514_s10 = sshll.u32 %s240_s9, 4  ;;  %s515_s10 = int_to_ptr.vmem [resolvable:$true] %s514_s10 }
  0x38   : > { %v301_v2 = vsub.s32 0, %v906_v1  ;;  %v342_v3 = vsub.s32 1, %v906_v1  ;;  %v248_v13 = vadd.f32 %v247_v9, %v246_v7  ;;  %v254_v14 = vmax.f32 %v252_v10, %v253_v11  ;;  %s500_s12 = scalar_lea.sflag [#allocation4], %s896_s13  ;;  %s697_s14 = scalar_lea.vmem %s515_s10, 128 }
  0x39   : > { %v356_v16 = vsub.s32 3, %v906_v1  ;;  %v924_v23 = vsub.s32 %v259_v20, %v906_v1  ;;  %v281_v25 = vsub.s32 %v278_v22, %v906_v1  ;;  %v349_v41 = vsub.s32 2, %v906_v1  ;;  %p698_p11 = scmp.ne.s32.totalorder %s515_s10, %s697_s14  ;;  %p1005_p12 = scmp.ne.s32.totalorder %s999_s30, 0 }
  0x3a   : > { %v336_v8 = vrot.slane %v331_v5, %v301_v2  ;;  %v343_v12 = vrot.slane %v331_v5, %v342_v3  ;;  %249 = vadd.xlane.f32.xlu0 %v248_v13  ;;  %vm439_vm4 = vcmask 1042434   ;;  %vm441_vm5 = vcmask 1043459   ;;  %s767_s29 = smov [#allocation5]  }
  0x3b   : > { %v357_v17 = vrot.slane %v331_v5, %v356_v16  ;;  %v350_v43 = vrot.slane %v331_v5, %v349_v41  ;;  %vm448_vm6 = vcmask 11264   ;;  %p699_p13 = pnand %p698_p11, %p1005_p12  ;;  %s701_s22 = sshll.u32 %s767_s29, 4  ;;  %s702_s22 = int_to_ptr.vmem [resolvable:$false] %s701_s22 }
  0x3c   : > { %338 = vbcast.lane.b32.xlu1 %v336_v8, 256  ;;  %s703_s17 = scalar_lea.vmem %s702_s22, 256  ;;  %p704_p3 = scmp.lt.s32.totalorder %s515_s10, %s702_s22 }
  0x3d   : > { %p700_p1 = pneg %p699_p13  ;;  %p705_p5 = scmp.lt.s32.totalorder %s703_s17, %s697_s14 }
  0x3e   : > { %255 = vmax.xlane.f32.xlu0 %v254_v14 }
  0x3f   : > { %p706_p8 = por %p705_p5, %p704_p3 }
  0x40   : > { %345 = vbcast.lane.b32.xlu1 %v343_v12, 256 }
  0x41   : > { %p707_p10 = pnand %p706_p8, %p700_p1 }
  0x54   : > { %324 = vbcast.lane.b32.xlu0 %v593_v15, 256 }
  0x58   : > { %359 = vbcast.lane.b32.xlu0 %v357_v17, 256 }
  0xae   : > { %v339_v44 = vpop.permute.xlu1 %338 }
  0xb2   : > { %v346_v45 = vpop.permute.xlu1 %345 }
  0xc3   : > { %v250_v21 = vpop.xlane.xlu0 %249 }
  0xc4   : > { %v251_v24 = vmul.f32 0.00390625, %v250_v21 }
  0xc6   : > { %v263_v27 = vrot.slane %v251_v24, %v924_v23 }
  0xc7   : > { %v256_v26 = vpop.xlane.xlu0 %255 }
  0xc8   : > { %v269_v28 = vrot.slane %v256_v26, %v924_v23  ;;  %v594_v26 = vld [vmem:[%s993_s4] ss:$0 sm:$0xff] }
  0xca   : > { %v272_v29 = vsel %vm271_vm1, %v263_v27, %v269_v28 }
  0xcb   : > { %v282_v30 = vrot.slane %v272_v29, %v281_v25  ;;  %v325_v46 = vpop.permute.xlu0 %324 }
  0xcd   : > { %v283_v31 = vcombine.high %v282_v30, %v282_v30  ;;  %v290_v32 = vrot.slane %v282_v30, %v281_v25 }
  0xcf   : > { %v302_v34 = vrot.slane %v290_v32, %v301_v2  ;;  %v297_v35 = vrot.slane %v283_v31, %v281_v25  ;;  %v360_v58 = vpop.permute.xlu0 %359 }
  0xd1   : > { %v309_v36 = vmul.f32 %v302_v34, %v298_v33  ;;  %v306_v37 = vrot.slane %v297_v35, %v301_v2 }
  0xd3   : > { %v312_v38 = vsel %vm311_vm2, %v309_v36, 0.0  ;;  %v310_v39 = vmul.f32 %v306_v37, %v298_v33 }
  0xd4   : > { %313 = vadd.xlane.f32.xlu1 %v312_v38 }
  0xd5   : > { %v315_v40 = vsel %vm311_vm2, %v310_v39, 0.0 }
  0xd8   : > { %316 = vadd.xlane.f32.xlu1 %v315_v40 }
  0xe9   : > { %352 = vbcast.lane.b32.xlu1 %v350_v43, 256 }
 0x15d   : > { %v314_v47 = vpop.xlane.xlu1 %313 }
 0x15e   : > { %v327_v48 = vadd.f32 %v325_v46, %v314_v47 }
 0x160   : > { %v329_v49 = vmax.f32 %v327_v48, 0.0 }
 0x161   : > { %v317_v50 = vpop.xlane.xlu1 %316 }
 0x162   : > { %v328_v51 = vadd.f32 %v325_v46, %v317_v50  ;;  %v366_v52 = vmul.f32 %v346_v45, %v329_v49  ;;  %v365_v53 = vmul.f32 %v339_v44, %v329_v49  ;;  %v368_v59 = vmul.f32 %v360_v58, %v329_v49 }
 0x164   : > { %v330_v54 = vmax.f32 %v328_v51, 0.0  ;;  %385 = vperm.xlu0 %655, %v366_v52   ;;  %382 = vperm.xlu1 %654, %v365_v53  }
 0x165   : > { %v353_v55 = vpop.permute.xlu1 %352 }
 0x166   : > { %v367_v56 = vmul.f32 %v353_v55, %v329_v49  ;;  %v369_v57 = vmul.f32 %v339_v44, %v330_v54  ;;  %v370_v60 = vmul.f32 %v346_v45, %v330_v54  ;;  %v371_v61 = vmul.f32 %v353_v55, %v330_v54 }
 0x167   : > { %v372_v62 = vmul.f32 %v360_v58, %v330_v54  ;;  %v766_v44 = vmov 839922192  }
 0x168   : > { %388 = vperm.xlu0 %655, %v367_v56   ;;  %394 = vperm.xlu1 %654, %v369_v57   ;;  %v490_v45 = vunpack.c.l.s4 %v766_v44 }
 0x16a   : > { %v491_v46 = vunpack.c.0.s8 %v490_v45 }
 0x16c   : > { %397 = vperm.xlu1 %654, %v370_v60   ;;  %391 = vperm.xlu0 %655, %v368_v59   ;;  %v494_v47 = vsub.s32 %v491_v46, %v906_v1 }
 0x170   : > { %400 = vperm.xlu1 %654, %v371_v61  }
 0x174   : > { %403 = vperm.xlu1 %654, %v372_v62  }
 0x1df   : > { %v383_v63 = vpop.permute.xlu1 %382  ;;  %v386_v0 = vpop.permute.xlu0 %385 }
 0x1e0   : > { %v408_v5 = vrot.slane %v383_v63, %v924_v23  ;;  %v412_v6 = vrot.slane %v386_v0, %v924_v23 }
 0x1e2   : > { %v438_v10 = vsel %vm437_vm3, %v412_v6, %v408_v5 }
 0x1e3   : > { %v395_v2 = vpop.permute.xlu1 %394  ;;  %v389_v3 = vpop.permute.xlu0 %388 }
 0x1e4   : > { %v416_v7 = vrot.slane %v389_v3, %v924_v23  ;;  %v424_v18 = vrot.slane %v395_v2, %v924_v23 }
 0x1e6   : > { %v440_v12 = vsel %vm439_vm4, %v416_v7, %v438_v10 }
 0x1e7   : > { %v398_v8 = vpop.permute.xlu1 %397  ;;  %v392_v9 = vpop.permute.xlu0 %391 }
 0x1e8   : > { %v420_v11 = vrot.slane %v392_v9, %v924_v23  ;;  %v428_v16 = vrot.slane %v398_v8, %v924_v23 }
 0x1ea   : > { %v442_v13 = vsel %vm441_vm5, %v420_v11, %v440_v12  ;;  %v443_v20 = vsel %vm437_vm3, %v428_v16, %v424_v18 }
 0x1eb   : > { %v401_v14 = vpop.permute.xlu1 %400  ;;  %v449_v15 = vsel %vm448_vm6, %v442_v13, 0.0 }
 0x1ec   : > { %450 = vadd.xlane.f32.xlu0 %v449_v15  ;;  %v432_v17 = vrot.slane %v401_v14, %v924_v23 }
 0x1ee   : > { %v444_v22 = vsel %vm439_vm4, %v432_v17, %v443_v20 }
 0x1ef   : > { %v404_v19 = vpop.permute.xlu1 %403 }
 0x1f0   : > { %v436_v21 = vrot.slane %v404_v19, %v924_v23 }
 0x1f2   : > { %v445_v24 = vsel %vm441_vm5, %v436_v21, %v444_v22 }
 0x1f3   : > { %v452_v25 = vsel %vm448_vm6, %v445_v24, 0.0 }
 0x1f4   : > { %453 = vadd.xlane.f32.xlu1 %v452_v25 }
 0x202   : > { %461 = vbcast.lane.b32.xlu0 %v594_v26, 256 }
 0x275   : > { %v451_v27 = vpop.xlane.xlu0 %450 }
 0x279   : > { %v462_v28 = vpop.permute.xlu0 %461 }
 0x27a   : > { %v464_v29 = vadd.f32 %v462_v28, %v451_v27 }
 0x27c   : > { %v595_v30 = vmul.f32 -1.442695, %v464_v29 }
 0x27d   : > { %v454_v31 = vpop.xlane.xlu1 %453 }
 0x27e   : > { %657 = vpow2.f32 %v595_v30  ;;  %v465_v32 = vadd.f32 %v462_v28, %v454_v31 }
 0x280   : > { %v596_v33 = vmul.f32 -1.442695, %v465_v32 }
 0x282   : > { %659 = vpow2.f32 %v596_v33 }
 0x28b   : > { %v658_v23 = vpop.eup %657 }
 0x28c   : > { %v472_v34 = vadd.f32 1.0, %v658_v23 }
 0x28e   : > { %661 = vrcp.f32 %v472_v34 }
 0x28f   : > { %v660_v35 = vpop.eup %659 }
 0x290   : > { %v473_v36 = vadd.f32 1.0, %v660_v35 }
 0x292   : > { %663 = vrcp.f32 %v473_v36 }
 0x29b   : > { %v662_v37 = vpop.eup %661 }
 0x29f   : > { %v664_v38 = vpop.eup %663 }
 0x2a0   : > { %v478_v39 = vadd.f32 %v664_v38, %v662_v37 }
 0x2a2   : > { %v597_v40 = vmul.f32 -1.442695, %v478_v39 }
 0x2a4   : > { %665 = vpow2.f32 %v597_v40 }
 0x2b1   : > { %v666_v41 = vpop.eup %665 }
 0x2b2   : > { %v482_v42 = vadd.f32 1.0, %v666_v41 }
 0x2b4   : > { %667 = vrcp.f32 %v482_v42 }
 0x2c1   : > { %v668_v43 = vpop.eup %667 }
 0x2c2   : > { %487 = vperm.xlu1 %654, %v668_v43  }
 0x33d   : > { %v488_v48 = vpop.permute.xlu1 %487 }
 0x33e   : > { %v495_v49 = vrot.slane %v488_v48, %v494_v47 }
 0x340   : > { %v497_v50 = vmul.f32 %v495_v49, %v910_v4 }
 0x342   : > { %498 = vst [vmem:[%s240_s9] sm:$0xff] %v497_v50 }
 0x343   : > { %710 = shalt.err (!%p707_p10)
}
 0x344   : > { %s711_s16 = scalar_lea.hbm %s512_s15, 128  ;;  %s715_s26 = scalar_lea.hbm %s994_s5, 256 }
 0x345   : > { %p712_p2 = scmp.ne.s32.totalorder %s512_s15, %s711_s16  ;;  %p716_p7 = scmp.lt.s32.totalorder %s512_s15, %s994_s5 }
 0x346   : > { %p717_p0 = scmp.lt.s32.totalorder %s715_s26, %s711_s16 }
 0x347   : > { %p713_p4 = pnand %p712_p2, %p1005_p12 }
 0x348   : > { %p718_p6 = por %p717_p0, %p716_p7 }
 0x349   : > { %p714_p9 = pneg %p713_p4 }
 0x34b   : > { %p719_p11 = pnand %p718_p6, %p714_p9 }
 0x34d   : > { %722 = shalt.err (!%p719_p11)
}
 0x34e   : > { %607 = dma.vmem_to_hbm [thread:$0]  (%p1005_p12), %s515_s10, 128, %s512_s15, %s500_s12  }
 0x34f PF: > { %s526_s7 = sand.u32 1, %s749_s18   ;;  %p1006_p13 = scmp.ne.s32.totalorder %s1000_s6, 0 }
 0x350   : > { %p1007_p1 = scmp.ge.s32.totalorder %s761_s21, 2  ;;  %s527_s9 = scalar_lea.sflag [#allocation4], %s526_s7 }
 0x352   : > { %p614_p3 = pnand %p1007_p1, %p1006_p13 }
 0x354   : > { %p615_p5 = pneg %p614_p3 }
 0x356   : > { %744 = dma.done.wait (%p615_p5), %s527_s9, 128  }
 0x357   : > { %746 = vsyncadd (%p615_p5), %s527_s9, 4294967168  ;;  %p18_p8 = scmp.ge.s32.totalorder %s823_s24, 4   ;;  %s1008_s18 = smov %s753_s19 }
 0x358   : > { %s1009_s19 = smov %s757_s20  ;;  %s1010_s20 = smov %s835_s27 }
 0x359   : > { %s1011_s21 = smov %s823_s24  ;;  %20 = sbr.rel (!%p18_p8) target bundleno = 5 (0x5), region = 85 }
 0x35e   :  { %532 = vsyncpa [#allocation3], 1 }
 0x35f   :  { %534 = vsyncpa [#allocation3 + $0x1], 1 }
 0x360   :  { %535 = vsyncpa [#allocation4], 1 }
 0x361   :  { %537 = vsyncpa [#allocation4 + $0x1], 1 }

</bundles_post_ra>
